<compile_context>
chip_gen: v5e
topology: v5e:2x2
jax: 0.10.0
libtpu: 0.0.40
codegen_flags: <defaults>
</compile_context>

<pallas_src>
import jax
import jax.numpy as jnp
from jax.experimental import pallas as pl
from jax.experimental.pallas import tpu as pltpu


def _round_up(x, m):
    return ((x + m - 1) // m) * m


def _cdiv(a, b):
    return (a + b - 1) // b


def _normalize_kernel(sb_ref, x_ref, o_ref):
    # sb_ref: (tile_r, 2) f32 -- column 0 = 1/std, column 1 = mean/std
    # x_ref / o_ref: (tile_r, tile_l)
    sb = sb_ref[...]
    scale = sb[:, 0:1]          # (tile_r, 1), broadcast across lanes
    bias = sb[:, 1:2]           # (tile_r, 1)
    x = x_ref[...].astype(jnp.float32)
    o_ref[...] = (x * scale - bias).astype(o_ref.dtype)


def _vmem_budget():
    """Returns (max bytes per x tile, scoped VMEM limit) for the local chip."""
    try:
        vmem_cap = int(pltpu.get_tpu_info().vmem_capacity_bytes)
    except Exception:
        vmem_cap = 64 * 1024 * 1024          # conservative (v7x-sized) default
    if vmem_cap >= 100 * 1024 * 1024:        # v5e / v6e: 128 MiB physical VMEM
        return 8 * 1024 * 1024, 64 * 1024 * 1024
    # v7x: 64 MiB physical per TensorCore -- leave headroom for 2x(in+out).
    return 5 * 1024 * 1024, 44 * 1024 * 1024


def normalize_by_channel_mean_std(x, mean, std):
    """Pallas TPU implementation of NormalizeByChannelMeanStd.forward.

    x:    (N, C, H, W) float array
    mean: (C,) float array
    std:  (C,) float array
    """
    N, C, H, W = x.shape
    R = N * C
    L = H * W
    itemsize = jnp.dtype(x.dtype).itemsize
    max_tile_bytes, vmem_limit = _vmem_budget()

    # ---- tile selection (x is never padded; partial last blocks are masked).
    L128 = _round_up(L, 128)
    lane_cap = max(128, ((max_tile_bytes // (8 * itemsize)) // 128) * 128)
    tile_l = min(L128, lane_cap)                       # multiple of 128
    rows_fit = max(8, ((max_tile_bytes // (tile_l * itemsize)) // 8) * 8)
    tile_r = min(_round_up(R, 8), rows_fit)            # multiple of 8

    n_r = _cdiv(R, tile_r)
    n_l = _cdiv(L, tile_l)

    # ---- per-row constants in f32: scale = 1/std, bias = mean/std, packed
    # as one (rows, 2) array.  Tiny (8 bytes per row), padded so its blocks
    # are never partial (pad values are never written back anyway).
    scale_c = 1.0 / std.astype(jnp.float32)                       # (C,)
    bias_c = mean.astype(jnp.float32) * scale_c                   # (C,)
    sb = jnp.tile(jnp.stack([scale_c, bias_c], axis=-1), (N, 1))  # (R, 2)
    rows_const = n_r * tile_r
    if rows_const != R:
        sb = jnp.pad(sb, ((0, rows_const - R), (0, 0)))

    # Free metadata-only reshape: (N, C, H, W) -> (N*C, H*W).
    x2 = x.reshape(R, L)

    # ---- grid: both axes "parallel".  If the row axis has a single block,
    # put the lane axis outermost so v7x's two TensorCores both get work.
    if n_r == 1 and n_l > 1:
        grid = (n_l, n_r)
        sb_map = lambda j, i: (i, 0)
        x_map = lambda j, i: (i, j)
    else:
        grid = (n_r, n_l)
        sb_map = lambda i, j: (i, 0)
        x_map = lambda i, j: (i, j)

    out = pl.pallas_call(
        _normalize_kernel,
        out_shape=jax.ShapeDtypeStruct((R, L), x.dtype),
        grid_spec=pltpu.PrefetchScalarGridSpec(
            num_scalar_prefetch=0,
            grid=grid,
            in_specs=[
                pl.BlockSpec((tile_r, 2), sb_map),        # packed scale/bias
                pl.BlockSpec((tile_r, tile_l), x_map),    # x
            ],
            out_specs=pl.BlockSpec((tile_r, tile_l), x_map),
        ),
        compiler_params=pltpu.CompilerParams(
            dimension_semantics=("parallel", "parallel"),
            vmem_limit_bytes=vmem_limit,
        ),
    )(sb, x2)

    return out.reshape(N, C, H, W)


if __name__ == "__main__":
    key = jax.random.PRNGKey(0)

    # --- main check: small, aligned shape (module implies NCHW + (C,) stats).
    N, C, H, W = 2, 4, 16, 16
    mean = jnp.array([0.485, 0.456, 0.406, 0.5], dtype=jnp.float32)
    std = jnp.array([0.229, 0.224, 0.225, 0.25], dtype=jnp.float32)
    x = jax.random.normal(key, (N, C, H, W), dtype=jnp.float32)

    out = normalize_by_channel_mean_std(x, mean, std)
    out = jax.block_until_ready(out)
    ref = (x - mean[None, :, None, None]) / std[None, :, None, None]
    assert out.shape == (N, C, H, W)
    assert jnp.allclose(out, ref, atol=1e-5, rtol=1e-5)

    # --- secondary check: non-(8,128)-aligned shape exercises the
    # partial-block path (no pad / no slice in the wrapper).
    key2 = jax.random.PRNGKey(1)
    N2, C2, H2, W2 = 2, 3, 15, 15
    mean2 = jnp.array([0.485, 0.456, 0.406], dtype=jnp.float32)
    std2 = jnp.array([0.229, 0.224, 0.225], dtype=jnp.float32)
    x2 = jax.random.normal(key2, (N2, C2, H2, W2), dtype=jnp.float32)

    out2 = normalize_by_channel_mean_std(x2, mean2, std2)
    out2 = jax.block_until_ready(out2)
    ref2 = (x2 - mean2[None, :, None, None]) / std2[None, :, None, None]
    assert out2.shape == (N2, C2, H2, W2)
    assert jnp.allclose(out2, ref2, atol=1e-5, rtol=1e-5)

    print("KERNEL_OK")
</pallas_src>

<mosaic_0001>
module attributes {stable_mosaic.version = 11 : i64} {
  func.func @_normalize_kernel(%arg0: i32, %arg1: i32, %arg2: memref<8x2xf32, #tpu.memory_space<vmem>>, %arg3: memref<8x256xf32, #tpu.memory_space<vmem>>, %arg4: memref<8x256xf32, #tpu.memory_space<vmem>>) attributes {dimension_semantics = [#tpu.dimension_semantics<parallel>, #tpu.dimension_semantics<parallel>], iteration_bounds = array<i64: 1, 1>, scalar_prefetch = 0 : i64, scratch_operands = 0 : i64, tpu.core_type = #tpu.core_type<tc>, window_params = [{transform_indices = @transform_0, window_bounds = array<i64: 8, 2>}, {transform_indices = @transform_1, window_bounds = array<i64: 8, 256>}, {transform_indices = @transform_2, window_bounds = array<i64: 8, 256>}]} {
    %c0 = arith.constant 0 : index
    %c0_0 = arith.constant 0 : index
    %0 = vector.load %arg2[%c0, %c0_0] : memref<8x2xf32, #tpu.memory_space<vmem>>, vector<8x2xf32>
    %1 = vector.extract_strided_slice %0 {offsets = [0, 0], sizes = [8, 1], strides = [1, 1]} : vector<8x2xf32> to vector<8x1xf32>
    %2 = vector.extract_strided_slice %0 {offsets = [0, 1], sizes = [8, 1], strides = [1, 1]} : vector<8x2xf32> to vector<8x1xf32>
    %c0_1 = arith.constant 0 : index
    %c0_2 = arith.constant 0 : index
    %3 = vector.load %arg3[%c0_1, %c0_2] : memref<8x256xf32, #tpu.memory_space<vmem>>, vector<8x256xf32>
    %4 = vector.broadcast %1 : vector<8x1xf32> to vector<8x256xf32>
    %5 = arith.mulf %3, %4 : vector<8x256xf32>
    %6 = vector.broadcast %2 : vector<8x1xf32> to vector<8x256xf32>
    %7 = arith.subf %5, %6 : vector<8x256xf32>
    %c0_3 = arith.constant 0 : index
    %c0_4 = arith.constant 0 : index
    %8 = vector.load %arg4[%c0_3, %c0_4] : memref<8x256xf32, #tpu.memory_space<vmem>>, vector<8x256xf32>
    tpu.vector_store %arg4[%c0_3, %c0_4], %7 {strides = array<i32>} : memref<8x256xf32, #tpu.memory_space<vmem>>, vector<8x256xf32>,
    return
  }
  func.func @transform_0(%arg0: i32, %arg1: i32) -> (i32, i32) {
    %c0_i32 = arith.constant 0 : i32
    %c0_i32_0 = arith.constant 0 : i32
    return %arg0, %c0_i32 : i32, i32
  }
  func.func @transform_1(%arg0: i32, %arg1: i32) -> (i32, i32) {
    %c0_i32 = arith.constant 0 : i32
    return %arg0, %arg1 : i32, i32
  }
  func.func @transform_2(%arg0: i32, %arg1: i32) -> (i32, i32) {
    %c0_i32 = arith.constant 0 : i32
    return %arg0, %arg1 : i32, i32
  }
}

</mosaic_0001>

<bundles_post_ra>
// kernel: tpu_custom_call.1
= control target key start
LH: loop header
LB: loop body
LE: loop exit
PB: predicated region body
PF: predicated region fallthrough
CT: control target
= control target key end

     0   :  { %7 = vsyncpa [#allocation3], 0  ;;  %s147_s0 = inlined_call_operand.vmem [shape: f32[8,2], index: 0, kind: input, shape index: {}]   ;;  %s148_s1 = inlined_call_operand.hbm [shape: f32[8,256], index: 1, kind: input, shape index: {}]   ;;  %s149_s2 = inlined_call_operand.hbm [shape: f32[8,256], index: 2, kind: output, shape index: {}]  }
   0x1   :  { %8 = vsyncpa [#allocation4], 0  ;;  %s16_s11 = sshll.u32 %s148_s1, 4  ;;  %s119_s12 = smov [#allocation2]   ;;  %s17_s11 = int_to_ptr.hbm [resolvable:$true] %s16_s11 }
   0x2   :  { %s18_s13 = sshll.u32 %s119_s12, 4  ;;  %s19_s13 = int_to_ptr.vmem [resolvable:$true] %s18_s13 }
   0x3   :  { %21 = dma.hbm_to_vmem [thread:$0]  %s17_s11, 256, %s19_s13, [#allocation3]  }
   0x4   :  { %115 = dma.done.wait [#allocation3], 256  }
   0x5   :  { %116 = vsyncadd [#allocation3], 4294967040  ;;  %v120_v0 = vmov 0   ;;  %v26_v1 = vld [vmem:[%s147_s0] sm:$0xff]  ;;  %v121_v2 = vmov 1   ;;  %v28_v5 = vld [vmem:[#allocation2 + $0x8] sm:$0xff] }
   0x6   :  { %65 = vset.pattern.permute.xlu0 %v120_v0  ;;  %v27_v4 = vld [vmem:[#allocation2] sm:$0xff]  ;;  %s122_s1 = smov [#allocation5]   ;;  %s51_s19 = sshll.u32 %s149_s2, 4  ;;  %s52_s19 = int_to_ptr.hbm [resolvable:$true] %s51_s19 }
   0x7   :  { %31 = vperm.xlu0 %65, %v26_v1   ;;  %s49_s16 = sshll.u32 %s122_s1, 4  ;;  %s50_s16 = int_to_ptr.vmem [resolvable:$true] %s49_s16 }
   0xf   :  { %66 = vset.pattern.permute.xlu0 %v121_v2 }
  0x10   :  { %37 = vperm.xlu0 %66, %v26_v1  }
  0x79   :  { %v32_v3 = vpop.permute.xlu0 %31 }
  0x7a   :  { %v34_v6 = vmul.f32 %v32_v3, %v27_v4  ;;  %v35_v7 = vmul.f32 %v32_v3, %v28_v5 }
  0x82   :  { %v38_v8 = vpop.permute.xlu0 %37 }
  0x83   :  { %v40_v9 = vsub.f32 %v34_v6, %v38_v8  ;;  %v41_v10 = vsub.f32 %v35_v7, %v38_v8 }
  0x85   :  { %42 = vst [vmem:[#allocation5] sm:$0xff] %v40_v9 }
  0x86   :  { %43 = vst [vmem:[#allocation5 + $0x8] sm:$0xff] %v41_v10 }
  0x87   :  { %54 = dma.vmem_to_hbm [thread:$0]  %s50_s16, 256, %s52_s19, [#allocation4]  }
  0x88   :  { %117 = dma.done.wait [#allocation4], 256  }
  0x89   :  { %118 = vsyncadd [#allocation4], 4294967040 }
  0x8a   :  { %59 = vsyncpa [#allocation3], 1 }
  0x8b   :  { %60 = vsyncpa [#allocation4], 1 }

</bundles_post_ra>
